<compile_context>
chip_gen: v6e
topology: v6e:2x2x1
jax: 0.10.0
libtpu: 0.0.40
codegen_flags: <defaults>
</compile_context>

<pallas_src>
import jax
import jax.numpy as jnp
from jax.experimental import pallas as pl
from jax.experimental.pallas import tpu as pltpu


def _conv1x1_gemm_kernel(x_ref, w_ref, b_ref, o_ref):
    # x_ref: (M, C_in)      f32   activation rows (channels on the lane axis)
    # w_ref: (C_in, C_out)  bf16  weight, pre-transposed once at init
    # b_ref: (1, C_out)     f32   bias (lane-dense row)
    # o_ref: (M, C_out)     f32   output (lane-dense rows)
    x = x_ref[...].astype(jnp.bfloat16)          # tiny (M, 1344) cast; keeps MXU in bf16
    acc = jnp.dot(x, w_ref[...],
                  preferred_element_type=jnp.float32)   # MXU, f32 accumulate -> (M, C_out)
    o_ref[...] = (acc + b_ref[...]).astype(o_ref.dtype)


def prepare_conv1x1_params(weight_oihw, bias):
    """One-time ('init') parameter prep.

    Transposes the torch (C_out, C_in, 1, 1) weight ONCE to (C_in, C_out) bf16
    so the kernel can feed the MXU directly, and lays the bias out as a
    lane-dense (1, C_out) f32 row.  No per-call work.
    """
    C_out, C_in = weight_oihw.shape[0], weight_oihw.shape[1]
    w_cico_bf16 = weight_oihw.reshape(C_out, C_in).T.astype(jnp.bfloat16)   # (C_in, C_out)
    b_row = bias.reshape(1, C_out).astype(jnp.float32)                      # (1, C_out)
    return w_cico_bf16, b_row


def conv2d_1x1(x_nchw, w_cico_bf16, b_row):
    """1x1 stride-1 Conv2d matching torch.nn.Conv2d(1344, 56, 1) for H = W = 1."""
    N, C_in, H, W = x_nchw.shape
    C_out = w_cico_bf16.shape[1]
    assert H == 1 and W == 1, "this module instance has 1x1 spatial extent"
    M = N  # rows of the GEMM; batching multiple calls into one amortizes the weight DMA

    # Pure reshape (no transpose): channels land on the lane axis.
    x2d = x_nchw.reshape(M, C_in).astype(jnp.float32)

    bytes_accessed = (C_in * C_out * 2      # bf16 weight (dominant)
                      + M * C_in * 4        # activations
                      + C_out * 4           # bias
                      + M * C_out * 4)      # output
    out2d = pl.pallas_call(
        _conv1x1_gemm_kernel,
        out_shape=jax.ShapeDtypeStruct((M, C_out), jnp.float32),
        in_specs=[
            pl.BlockSpec(memory_space=pltpu.MemorySpace.VMEM),  # x   (M, C_in)     f32
            pl.BlockSpec(memory_space=pltpu.MemorySpace.VMEM),  # w   (C_in, C_out) bf16
            pl.BlockSpec(memory_space=pltpu.MemorySpace.VMEM),  # b   (1, C_out)    f32
        ],
        out_specs=pl.BlockSpec(memory_space=pltpu.MemorySpace.VMEM),
        cost_estimate=pl.CostEstimate(
            flops=2 * M * C_in * C_out,
            bytes_accessed=bytes_accessed,
            transcendentals=0,
        ),
    )(x2d, w_cico_bf16, b_row)

    # (M, C_out) -> NCHW (N, C_out, 1, 1): pure reshape, no transpose.
    return out2d.reshape(N, C_out, H, W)


if __name__ == "__main__":
    key = jax.random.PRNGKey(0)
    k_x, k_w, k_b = jax.random.split(key, 3)

    N, C_in, H, W = 1, 1344, 1, 1
    C_out = 56

    # Deterministic synthetic tensors matching Conv2d(1344, 56, kernel_size=1).
    x = jax.random.normal(k_x, (N, C_in, H, W), dtype=jnp.float32)
    bound = 1.0 / (float(C_in) ** 0.5)
    weight = jax.random.uniform(k_w, (C_out, C_in, 1, 1),
                                minval=-bound, maxval=bound, dtype=jnp.float32)
    bias = jax.random.uniform(k_b, (C_out,),
                              minval=-bound, maxval=bound, dtype=jnp.float32)

    # One-time parameter preparation (the "init" path).
    w_cico_bf16, b_row = prepare_conv1x1_params(weight, bias)

    out = conv2d_1x1(x, w_cico_bf16, b_row)
    out = jax.block_until_ready(out)
    assert out.shape == (N, C_out, H, W), out.shape

    # Tight check: exactly the math the kernel performs (bf16 x bf16 MXU dot,
    # f32 accumulation, f32 bias add).
    x_bf16 = x.reshape(1, C_in).astype(jnp.bfloat16)
    ref_tight = (jnp.dot(x_bf16, w_cico_bf16, preferred_element_type=jnp.float32)
                 + b_row)                                            # (1, C_out)
    assert jnp.allclose(out.reshape(1, C_out), ref_tight, atol=1e-3, rtol=1e-3)

    # Loose check vs. full-f32 torch-conv math (only bf16 quantization differs).
    ref_f32 = weight.reshape(C_out, C_in) @ x.reshape(C_in) + bias   # (C_out,)
    assert jnp.allclose(out.reshape(C_out), ref_f32, atol=5e-2, rtol=5e-2)

    print("KERNEL_OK")
</pallas_src>

<mosaic_0001>
module attributes {stable_mosaic.version = 11 : i64} {
  func.func @_conv1x1_gemm_kernel(%arg0: memref<1x1344xf32, #tpu.memory_space<vmem>>, %arg1: memref<1344x56xbf16, #tpu.memory_space<vmem>>, %arg2: memref<1x56xf32, #tpu.memory_space<vmem>>, %arg3: memref<1x56xf32, #tpu.memory_space<vmem>>) attributes {dimension_semantics = [], scalar_prefetch = 0 : i64, scratch_operands = 0 : i64, tpu.core_type = #tpu.core_type<tc>} {
    %c0 = arith.constant 0 : index
    %c0_0 = arith.constant 0 : index
    %0 = vector.load %arg0[%c0, %c0_0] : memref<1x1344xf32, #tpu.memory_space<vmem>>, vector<1x1344xf32>
    %1 = arith.truncf %0 : vector<1x1344xf32> to vector<1x1344xbf16>
    %c0_1 = arith.constant 0 : index
    %c0_2 = arith.constant 0 : index
    %2 = vector.load %arg1[%c0_1, %c0_2] : memref<1344x56xbf16, #tpu.memory_space<vmem>>, vector<1344x56xbf16>
    %cst = arith.constant dense<0.000000e+00> : vector<1x56xf32>
    %3 = tpu.matmul %1, %2, %cst {dimension_numbers = #tpu.dot_dimension_numbers<[1], [0], [0], [1], [0, 0, 1, 1], [], []>} : vector<1x1344xbf16>, vector<1344x56xbf16>, vector<1x56xf32> -> vector<1x56xf32>
    %c0_3 = arith.constant 0 : index
    %c0_4 = arith.constant 0 : index
    %4 = vector.load %arg2[%c0_3, %c0_4] : memref<1x56xf32, #tpu.memory_space<vmem>>, vector<1x56xf32>
    %5 = arith.addf %3, %4 : vector<1x56xf32>
    %c0_5 = arith.constant 0 : index
    %c0_6 = arith.constant 0 : index
    %6 = vector.load %arg3[%c0_5, %c0_6] : memref<1x56xf32, #tpu.memory_space<vmem>>, vector<1x56xf32>
    tpu.vector_store %arg3[%c0_5, %c0_6], %5 {strides = array<i32>} : memref<1x56xf32, #tpu.memory_space<vmem>>, vector<1x56xf32>,
    return
  }
}

</mosaic_0001>

<bundles_post_ra>
// kernel: tpu_custom_call.1
= control target key start
LH: loop header
LB: loop body
LE: loop exit
PB: predicated region body
PF: predicated region fallthrough
CT: control target
= control target key end

     0   :  { %v20_v17 = vlaneseq  ;;  %vm1341_vm0 = vmmov 0   ;;  %s1664_s0 = inlined_call_operand.vmem [shape: f32[1,1344], index: 0, kind: input, shape index: {}]   ;;  %s1665_s1 = inlined_call_operand.vmem [shape: bf16[1344,56], index: 1, kind: input, shape index: {}]   ;;  %s1666_s2 = inlined_call_operand.vmem [shape: f32[1,56], index: 2, kind: input, shape index: {}]   ;;  %s1667_s3 = inlined_call_operand.hbm [shape: f32[1,56], index: 3, kind: output, shape index: {}]  }
   0x1   :  { %v1234_v0 = vld [vmem:[%s1665_s1 + $0x78] sm:$0xff]   ;;  %v1238_v4 = vld [vmem:[%s1665_s1 + $0x70] sm:$0xff]   ;;  %v1242_v8 = vld [vmem:[%s1665_s1 + $0x68] sm:$0xff]  }
   0x2   :  { %v1235_v1 = vld [vmem:[%s1665_s1 + $0x38] sm:$0xff]   ;;  %1104 = vmatprep.subr.bf16.mxu0 %v1234_v0  ;;  %v1239_v5 = vld [vmem:[%s1665_s1 + $0x30] sm:$0xff]   ;;  %v1243_v9 = vld [vmem:[%s1665_s1 + $0x28] sm:$0xff]   ;;  %v1426_v22 = vshrl.u32 %v20_v17, 7 }
   0x3   :  { %v1236_v2 = vld [vmem:[%s1665_s1 + $0xf8] sm:$0xff]   ;;  %1105 = vmatpush3.bf16.msra.mxu0 %v1235_v1  ;;  %v1240_v6 = vld [vmem:[%s1665_s1 + $0xf0] sm:$0xff]   ;;  %v1244_v10 = vld [vmem:[%s1665_s1 + $0xe8] sm:$0xff]  }
   0x4   :  { %v1237_v3 = vld [vmem:[%s1665_s1 + $0xb8] sm:$0xff]   ;;  %1126 = vmatprep.subr.bf16.mxu1 %v1236_v2  ;;  %1106 = vmatprep.subr.bf16.mxu0 %v1238_v4  ;;  %v1241_v7 = vld [vmem:[%s1665_s1 + $0xb0] sm:$0xff]   ;;  %v1245_v11 = vld [vmem:[%s1665_s1 + $0xa8] sm:$0xff]   ;;  %v26_v27 = vsub.s32 1, %v1426_v22  ;;  %v22_v29 = vsub.s32 0, %v1426_v22  ;;  %v34_v31 = vsub.s32 3, %v1426_v22 }
   0x5   :  { %1127 = vmatpush3.bf16.msra.mxu1 %v1237_v3  ;;  %v1246_v12 = vld [vmem:[%s1665_s1 + $0x60] sm:$0xff]   ;;  %v1250_v16 = vld [vmem:[%s1665_s1 + $0x58] sm:$0xff]   ;;  %v1254_v21 = vld [vmem:[%s1665_s1 + $0x50] sm:$0xff]   ;;  %v30_v33 = vsub.s32 2, %v1426_v22  ;;  %v42_v35 = vsub.s32 5, %v1426_v22  ;;  %v50_v37 = vsub.s32 7, %v1426_v22 }
   0x6   :  { %1128 = vmatprep.subr.bf16.mxu1 %v1240_v6  ;;  %v1247_v13 = vld [vmem:[%s1665_s1 + $0x20] sm:$0xff]   ;;  %v1251_v18 = vld [vmem:[%s1665_s1 + $0x18] sm:$0xff]   ;;  %v1255_v23 = vld [vmem:[%s1665_s1 + $0x10] sm:$0xff]  }
   0x7   :  { %1107 = vmatpush3.bf16.msra.mxu0 %v1239_v5  ;;  %v1248_v14 = vld [vmem:[%s1665_s1 + $0xe0] sm:$0xff]   ;;  %v1252_v19 = vld [vmem:[%s1665_s1 + $0xd8] sm:$0xff]   ;;  %v1256_v24 = vld [vmem:[%s1665_s1 + $0xd0] sm:$0xff]  }
   0x8   :  { %1108 = vmatprep.subr.bf16.mxu0 %v1242_v8  ;;  %v1249_v15 = vld [vmem:[%s1665_s1 + $0xa0] sm:$0xff]   ;;  %v1253_v20 = vld [vmem:[%s1665_s1 + $0x98] sm:$0xff]   ;;  %v1257_v25 = vld [vmem:[%s1665_s1 + $0x90] sm:$0xff]  }
   0x9   :  { %1129 = vmatpush3.bf16.msra.mxu1 %v1241_v7  ;;  %v1258_v26 = vld [vmem:[%s1665_s1 + $0x48] sm:$0xff]   ;;  %v1262_v34 = vld [vmem:[%s1665_s1 + $0x40] sm:$0xff]   ;;  %v1266_v45 = vld [vmem:[%s1665_s1 + $0x178] sm:$0xff]  }
   0xa   :  { %1130 = vmatprep.subr.bf16.mxu1 %v1244_v10  ;;  %v1259_v28 = vld [vmem:[%s1665_s1 + $0x8] sm:$0xff]   ;;  %v1263_v36 = vld [vmem:[%s1665_s1] sm:$0xff]   ;;  %v1267_v51 = vld [vmem:[%s1665_s1 + $0x138] sm:$0xff]  }
   0xb   :  { %1109 = vmatpush3.bf16.msra.mxu0 %v1243_v9  ;;  %v1260_v30 = vld [vmem:[%s1665_s1 + $0xc8] sm:$0xff]   ;;  %v1264_v38 = vld [vmem:[%s1665_s1 + $0xc0] sm:$0xff]   ;;  %v1268_v53 = vld [vmem:[%s1665_s1 + $0x1f8] sm:$0xff]  }
   0xc   :  { %1110 = vmatprep.subr.bf16.mxu0 %v1246_v12  ;;  %v1261_v32 = vld [vmem:[%s1665_s1 + $0x88] sm:$0xff]   ;;  %v1467_v39 = vld [vmem:[%s1664_s0] sm:$0xff]  ;;  %v1269_v54 = vld [vmem:[%s1665_s1 + $0x1b8] sm:$0xff]  }
   0xd   :  { %1131 = vmatpush3.bf16.msra.mxu1 %v1245_v11  ;;  %v27_v40 = vrot.slane %v1467_v39, %v26_v27  ;;  %v1265_v41 = vld [vmem:[%s1665_s1 + $0x80] sm:$0xff]   ;;  %v23_v42 = vrot.slane %v1467_v39, %v22_v29  ;;  %v35_v43 = vrot.slane %v1467_v39, %v34_v31  ;;  %v31_v44 = vrot.slane %v1467_v39, %v30_v33  ;;  %v1270_v57 = vld [vmem:[%s1665_s1 + $0x170] sm:$0xff]   ;;  %v1274_v61 = vld [vmem:[%s1665_s1 + $0x168] sm:$0xff]  }
   0xe   :  { %1132 = vmatprep.subr.bf16.mxu1 %v1248_v14  ;;  %v43_v46 = vrot.slane %v1467_v39, %v42_v35  ;;  %v51_v47 = vrot.slane %v1467_v39, %v50_v37  ;;  %v1271_v58 = vld [vmem:[%s1665_s1 + $0x130] sm:$0xff]   ;;  %v1275_v62 = vld [vmem:[%s1665_s1 + $0x128] sm:$0xff]   ;;  %v1278_v1 = vld [vmem:[%s1665_s1 + $0x160] sm:$0xff]   ;;  %v38_v14 = vsub.s32 4, %v1426_v22 }
   0xf   :  { %1111 = vmatpush3.bf16.msra.mxu0 %v1247_v13  ;;  %v76_v48 = vpack.c.bf16 %v27_v40, %v27_v40  ;;  %v75_v49 = vpack.c.bf16 %v23_v42, %v23_v42  ;;  %v78_v50 = vpack.c.bf16 %v35_v43, %v35_v43  ;;  %v77_v52 = vpack.c.bf16 %v31_v44, %v31_v44  ;;  %v1272_v59 = vld [vmem:[%s1665_s1 + $0x1f0] sm:$0xff]   ;;  %v1276_v63 = vld [vmem:[%s1665_s1 + $0x1e8] sm:$0xff]   ;;  %v1279_v2 = vld [vmem:[%s1665_s1 + $0x120] sm:$0xff]  }
  0x10   :  { %1112 = vmatprep.subr.bf16.mxu0 %v1250_v16  ;;  %v80_v55 = vpack.c.bf16 %v43_v46, %v43_v46  ;;  %v82_v56 = vpack.c.bf16 %v51_v47, %v51_v47  ;;  %v1273_v60 = vld [vmem:[%s1665_s1 + $0x1b0] sm:$0xff]   ;;  %v1277_v0 = vld [vmem:[%s1665_s1 + $0x1a8] sm:$0xff]   ;;  %v1280_v3 = vld [vmem:[%s1665_s1 + $0x1e0] sm:$0xff]   ;;  %v46_v16 = vsub.s32 6, %v1426_v22 }
  0x11   :  { %1133 = vmatpush3.bf16.msra.mxu1 %v1249_v15  ;;  %795 = vmatprep.mubr.bf16.mxu0 %v76_v48  ;;  %v1281_v4 = vld [vmem:[%s1665_s1 + $0x1a0] sm:$0xff]   ;;  %v1282_v5 = vld [vmem:[%s1665_s1 + $0x158] sm:$0xff]   ;;  %v1286_v9 = vld [vmem:[%s1665_s1 + $0x150] sm:$0xff]  }
  0x12   :  { %1134 = vmatprep.subr.bf16.mxu1 %v1252_v19  ;;  %835 = vmatprep.mubr.bf16.mxu1 %v78_v50  ;;  %v1283_v6 = vld [vmem:[%s1665_s1 + $0x118] sm:$0xff]   ;;  %v1287_v10 = vld [vmem:[%s1665_s1 + $0x110] sm:$0xff]   ;;  %v1290_v13 = vld [vmem:[%s1665_s1 + $0x148] sm:$0xff]  }
  0x13   :  { %1113 = vmatpush3.bf16.msra.mxu0 %v1251_v18  ;;  %v1284_v7 = vld [vmem:[%s1665_s1 + $0x1d8] sm:$0xff]   ;;  %v1288_v11 = vld [vmem:[%s1665_s1 + $0x1d0] sm:$0xff]   ;;  %v1291_v15 = vld [vmem:[%s1665_s1 + $0x108] sm:$0xff]  }
  0x14   :  { %1114 = vmatprep.subr.bf16.mxu0 %v1254_v21  ;;  %v1285_v8 = vld [vmem:[%s1665_s1 + $0x198] sm:$0xff]   ;;  %v1289_v12 = vld [vmem:[%s1665_s1 + $0x190] sm:$0xff]   ;;  %v1567_v17 = vld [vmem:[%s1664_s0 + $0x8] sm:$0x7]  ;;  %v39_v21 = vrot.slane %v1467_v39, %v38_v14 }
  0x15   :  { %1135 = vmatpush3.bf16.msra.mxu1 %v1253_v20  ;;  %v1292_v18 = vld [vmem:[%s1665_s1 + $0x1c8] sm:$0xff]   ;;  %v1294_v20 = vld [vmem:[%s1665_s1 + $0x140] sm:$0xff]   ;;  %v1298_v31 = vld [vmem:[%s1665_s1 + $0x278] sm:$0xff]   ;;  %v63_v47 = vrot.slane %v1567_v17, %v30_v33 }
  0x16   :  { %1136 = vmatprep.subr.bf16.mxu1 %v1256_v24  ;;  %v1293_v19 = vld [vmem:[%s1665_s1 + $0x188] sm:$0xff]   ;;  %v47_v24 = vrot.slane %v1467_v39, %v46_v16  ;;  %v1300_v35 = vld [vmem:[%s1665_s1 + $0x270] sm:$0xff]   ;;  %v1306_v39 = vld [vmem:[%s1665_s1 + $0x298] sm:$0xff]  }
  0x17   :  { %1115 = vmatpush3.bf16.msra.mxu0 %v1255_v23  ;;  %v1295_v23 = vld [vmem:[%s1665_s1 + $0x100] sm:$0xff]   ;;  %v1301_v37 = vld [vmem:[%s1665_s1 + $0x230] sm:$0xff]   ;;  %v1303_v40 = vld [vmem:[%s1665_s1 + $0x228] sm:$0xff]  }
  0x18   :  { %1116 = vmatprep.subr.bf16.mxu0 %v1258_v26  ;;  %v1297_v26 = vld [vmem:[%s1665_s1 + $0x180] sm:$0xff]   ;;  %v1309_v42 = vld [vmem:[%s1665_s1 + $0x290] sm:$0xff]   ;;  %v1307_v44 = vld [vmem:[%s1665_s1 + $0x258] sm:$0xff]  }
  0x19   :  { %1137 = vmatpush3.bf16.msra.mxu1 %v1257_v25  ;;  %v1296_v25 = vld [vmem:[%s1665_s1 + $0x1c0] sm:$0xff]   ;;  %v1308_v46 = vld [vmem:[%s1665_s1 + $0x218] sm:$0xff]   ;;  %v1310_v48 = vld [vmem:[%s1665_s1 + $0x250] sm:$0xff]  }
  0x1a   :  { %1138 = vmatprep.subr.bf16.mxu1 %v1260_v30  ;;  %v79_v30 = vpack.c.bf16 %v39_v21, %v39_v21  ;;  %v1305_v43 = vld [vmem:[%s1665_s1 + $0x220] sm:$0xff]  }
  0x1b   :  { %1117 = vmatpush3.bf16.msra.mxu0 %v1259_v28  ;;  %v59_v28 = vrot.slane %v1567_v17, %v26_v27 }
  0x1c   :  { %1118 = vmatprep.subr.bf16.mxu0 %v1262_v34  ;;  %v81_v34 = vpack.c.bf16 %v47_v24, %v47_v24 }
  0x1d   :  { %1139 = vmatpush3.bf16.msra.mxu1 %v1261_v32  ;;  %v1299_v32 = vld [vmem:[%s1665_s1 + $0x238] sm:$0xff]   ;;  %v84_v27 = vpack.c.bf16 %v59_v28, %v59_v28 }
  0x1e   :  { %1140 = vmatprep.subr.bf16.mxu1 %v1264_v38  ;;  %v1302_v38 = vld [vmem:[%s1665_s1 + $0x268] sm:$0xff]  }
  0x1f   :  { %1119 = vmatpush3.bf16.msra.mxu0 %v1263_v36  ;;  %v1340_v36 = vmov 0.0  }
  0x20   :  { %1148 = vmatprep.subr.bf16.mxu0 %v1266_v45  ;;  %v1312_v45 = vld [vmem:[%s1665_s1 + $0x288] sm:$0xff]  }
  0x21   :  { %1141 = vmatpush3.bf16.msra.mxu1 %v1265_v41  ;;  %v1304_v41 = vld [vmem:[%s1665_s1 + $0x260] sm:$0xff]  }
  0x22   :  { %796 = vmatmul.mubr.bf16.vlgmr.msra.gmra.mxu0 %v75_v49  ;;  %1170 = vmatprep.subr.bf16.mxu1 %v1268_v53  ;;  %v1315_v49 = vld [vmem:[%s1665_s1 + $0x280] sm:$0xff]  }
  0x23   :  { %1149 = vmatpush3.bf16.msra.mxu0 %v1267_v51  ;;  %875 = vmatprep.mubr.bf16.mxu0 %v80_v55 }
  0x24   :  { %836 = vmatmul.mubr.bf16.vlgmr.msra.gmra.mxu1 %v77_v52  ;;  %1150 = vmatprep.subr.bf16.mxu0 %v1270_v57 }
  0x25   :  { %1171 = vmatpush3.bf16.msra.mxu1 %v1269_v54  ;;  %915 = vmatprep.mubr.bf16.mxu1 %v82_v56 }
  0x26   :  { %1172 = vmatprep.subr.bf16.mxu1 %v1272_v59 }
  0x27   :  { %1151 = vmatpush3.bf16.msra.mxu0 %v1271_v58 }
  0x28   :  { %1152 = vmatprep.subr.bf16.mxu0 %v1274_v61 }
  0x29   :  { %1173 = vmatpush3.bf16.msra.mxu1 %v1273_v60 }
  0x2a   :  { %1174 = vmatprep.subr.bf16.mxu1 %v1276_v63 }
  0x2b   :  { %1153 = vmatpush3.bf16.msra.mxu0 %v1275_v62 }
  0x2c   :  { %1154 = vmatprep.subr.bf16.mxu0 %v1278_v1 }
  0x2d   :  { %1175 = vmatpush3.bf16.msra.mxu1 %v1277_v0 }
  0x2e   :  { %1176 = vmatprep.subr.bf16.mxu1 %v1280_v3 }
  0x2f   :  { %1155 = vmatpush3.bf16.msra.mxu0 %v1279_v2 }
  0x30   :  { %1156 = vmatprep.subr.bf16.mxu0 %v1282_v5 }
  0x31   :  { %1177 = vmatpush3.bf16.msra.mxu1 %v1281_v4 }
  0x32   :  { %1178 = vmatprep.subr.bf16.mxu1 %v1284_v7 }
  0x33   :  { %1157 = vmatpush3.bf16.msra.mxu0 %v1283_v6 }
  0x34   :  { %1158 = vmatprep.subr.bf16.mxu0 %v1286_v9 }
  0x35   :  { %1179 = vmatpush3.bf16.msra.mxu1 %v1285_v8 }
  0x36   :  { %1180 = vmatprep.subr.bf16.mxu1 %v1288_v11 }
  0x37   :  { %1159 = vmatpush3.bf16.msra.mxu0 %v1287_v10 }
  0x38   :  { %1160 = vmatprep.subr.bf16.mxu0 %v1290_v13 }
  0x39   :  { %1181 = vmatpush3.bf16.msra.mxu1 %v1289_v12 }
  0x3a   :  { %1182 = vmatprep.subr.bf16.mxu1 %v1292_v18 }
  0x3b   :  { %1161 = vmatpush3.bf16.msra.mxu0 %v1291_v15 }
  0x3c   :  { %1162 = vmatprep.subr.bf16.mxu0 %v1294_v20 }
  0x3d   :  { %1183 = vmatpush3.bf16.msra.mxu1 %v1293_v19 }
  0x3e   :  { %1184 = vmatprep.subr.bf16.mxu1 %v1296_v25 }
  0x3f   :  { %1163 = vmatpush3.bf16.msra.mxu0 %v1295_v23 }
  0x40   :  { %1192 = vmatprep.subr.bf16.mxu0 %v1298_v31 }
  0x41   :  { %1185 = vmatpush3.bf16.msra.mxu1 %v1297_v26 }
  0x42   :  { %1219 = vmatprep.subr.bf16.mxu1 %v1340_v36  ;;  %876 = vmatmul.mubr.bf16.vlgmr.msra.gmra.mxu0 %v79_v30 }
  0x43   :  { %1193 = vmatpush3.bf16.msra.mxu0 %v1299_v32  ;;  %955 = vmatprep.mubr.bf16.mxu0 %v84_v27 }
  0x44   :  { %916 = vmatmul.mubr.bf16.vlgmr.msra.gmra.mxu1 %v81_v34  ;;  %1194 = vmatprep.subr.bf16.mxu0 %v1300_v35 }
  0x45   :  { %1227 = vmatprep.mubr.msk.bf16.mxu1 %vm1341_vm0, %v1340_v36  ;;  %1220 = vmatpush3.bf16.msra.mxu1 %v1306_v39 }
  0x46   :  { %1221 = vmatprep.subr.bf16.mxu1 %v1340_v36 }
  0x47   :  { %1195 = vmatpush3.bf16.msra.mxu0 %v1301_v37 }
  0x48   :  { %1196 = vmatprep.subr.bf16.mxu0 %v1302_v38 }
  0x49   :  { %1222 = vmatpush3.bf16.msra.mxu1 %v1309_v42 }
  0x4a   :  { %1223 = vmatprep.subr.bf16.mxu1 %v1340_v36 }
  0x4b   :  { %1197 = vmatpush3.bf16.msra.mxu0 %v1303_v40 }
  0x4c   :  { %1198 = vmatprep.subr.bf16.mxu0 %v1304_v41 }
  0x4d   :  { %1224 = vmatpush3.bf16.msra.mxu1 %v1312_v45 }
  0x4e   :  { %1225 = vmatprep.subr.bf16.mxu1 %v1340_v36 }
  0x4f   :  { %1199 = vmatpush3.bf16.msra.mxu0 %v1305_v43 }
  0x50   :  { %1200 = vmatprep.subr.bf16.mxu0 %v1307_v44 }
  0x51   :  { %8 = vsyncpa [#allocation3], 0  ;;  %v85_v50 = vpack.c.bf16 %v63_v47, %v63_v47  ;;  %v1311_v51 = vld [vmem:[%s1665_s1 + $0x210] sm:$0xff]   ;;  %v1313_v33 = vld [vmem:[%s1665_s1 + $0x248] sm:$0xff]   ;;  %1226 = vmatpush3.bf16.msra.mxu1 %v1315_v49  ;;  %vm759_vm1 = vcmask 523264   ;;  %v55_v54 = vrot.slane %v1567_v17, %v22_v29  ;;  %s1342_s21 = smov [#allocation2]  }
  0x52   :  { %v1314_v52 = vld [vmem:[%s1665_s1 + $0x208] sm:$0xff]   ;;  %v1316_v53 = vld [vmem:[%s1665_s1 + $0x240] sm:$0xff]   ;;  %s1011_s22 = sshll.u32 %s1342_s21, 4  ;;  %vm1003_vm2 = vcmask 450560   ;;  %s1012_s22 = int_to_ptr.vmem [resolvable:$true] %s1011_s22 }
  0x53   :  { %1201 = vmatpush3.bf16.msra.mxu0 %v1308_v46  ;;  %v1317_v55 = vld [vmem:[%s1665_s1 + $0x200] sm:$0xff]   ;;  %v83_v56 = vpack.c.bf16 %v55_v54, %v55_v54  ;;  %s1322_s23 = scalar_lea.vmem %s1012_s22, 32  ;;  %p1323_p1 = scmp.lt.s32.totalorder %s1012_s22, %s1012_s22 }
  0x54   :  { %1202 = vmatprep.subr.bf16.mxu0 %v1310_v48  ;;  %1228 = vmatmul.mubr.msk.bf16.vlgmr.msra.gmra.mxu1 %vm759_vm1, %v85_v50  ;;  %v254_v9 = vld [vmem:[%s1666_s2] sm:$0x1]  ;;  %s1318_s2 = scalar_lea.vmem %s1012_s22, 16 }
  0x55   :  { %p1319_p0 = scmp.ne.s32.totalorder %s1012_s22, %s1318_s2  ;;  %p1324_p2 = scmp.lt.s32.totalorder %s1322_s23, %s1318_s2 }
  0x57   :  { %1203 = vmatpush3.bf16.msra.mxu0 %v1311_v51  ;;  %p1325_p3 = por %p1324_p2, %p1323_p1 }
  0x58   :  { %1204 = vmatprep.subr.bf16.mxu0 %v1313_v33 }
  0x59   :  { %p1326_p4 = pnand %p1325_p3, %p1319_p0 }
  0x5b   :  { %1205 = vmatpush3.bf16.msra.mxu0 %v1314_v52 }
  0x5c   :  { %1206 = vmatprep.subr.bf16.mxu0 %v1316_v53 }
  0x5f   :  { %1207 = vmatpush3.bf16.msra.mxu0 %v1317_v55 }
  0x62   :  { %956 = vmatmul.mubr.bf16.vlgmr.msra.gmra.mxu0 %v83_v56 }
  0xe2   :  { %v1120_v57 = vpop.f32.mrf.mxu0 }
  0xe4   :  { %v1142_v58 = vpop.f32.mrf.mxu1  ;;  %v1121_v59 = vpop.f32.mrf.mxu0 }
  0xe5   :  { %v1122_v7 = vadd.f32 %v1121_v59, %v1120_v57 }
  0xe6   :  { %v1143_v60 = vpop.f32.mrf.mxu1  ;;  %v1123_v61 = vpop.f32.mrf.mxu0 }
  0xe7   :  { %v798_v11 = vadd.f32 %v1122_v7, %v254_v9  ;;  %v1144_v12 = vadd.f32 %v1143_v60, %v1142_v58 }
  0xe8   :  { %v1145_v62 = vpop.f32.mrf.mxu1  ;;  %v1124_v63 = vpop.f32.mrf.mxu0 }
  0xe9   :  { %v838_v16 = vadd.f32 %v1144_v12, %v798_v11 }
  0xea   :  { %v1146_v0 = vpop.f32.mrf.mxu1 }
 0x102   :  { %v1164_v22 = vpop.f32.mrf.mxu0 }
 0x104   :  { %v1186_v1 = vpop.f32.mrf.mxu1  ;;  %v1165_v29 = vpop.f32.mrf.mxu0 }
 0x105   :  { %v1166_v14 = vadd.f32 %v1165_v29, %v1164_v22 }
 0x106   :  { %v1187_v2 = vpop.f32.mrf.mxu1  ;;  %v1167_v3 = vpop.f32.mrf.mxu0 }
 0x107   :  { %v878_v17 = vadd.f32 %v1166_v14, %v838_v16  ;;  %v1188_v18 = vadd.f32 %v1187_v2, %v1186_v1 }
 0x108   :  { %v1189_v4 = vpop.f32.mrf.mxu1  ;;  %v1168_v5 = vpop.f32.mrf.mxu0 }
 0x109   :  { %v918_v21 = vadd.f32 %v1188_v18, %v878_v17 }
 0x10a   :  { %v1190_v6 = vpop.f32.mrf.mxu1 }
 0x114   :  { %v997_v8 = vpop.f32.mrf.mxu1 }
 0x116   :  { %v1229_v10 = vpop.f32.mrf.mxu1 }
 0x118   :  { %v1000_v13 = vpop.f32.mrf.mxu1 }
 0x11a   :  { %v1230_v15 = vpop.f32.mrf.mxu1 }
 0x122   :  { %v1208_v19 = vpop.f32.mrf.mxu0 }
 0x124   :  { %v1209_v20 = vpop.f32.mrf.mxu0 }
 0x125   :  { %v1210_v23 = vadd.f32 %v1209_v20, %v1208_v19 }
 0x126   :  { %v1211_v24 = vpop.f32.mrf.mxu0 }
 0x127   :  { %v958_v25 = vadd.f32 %v1210_v23, %v918_v21 }
 0x128   :  { %v1212_v26 = vpop.f32.mrf.mxu0 }
 0x129   :  { %v998_v28 = vadd.f32 %v997_v8, %v958_v25 }
 0x12b   :  { %1004 = vst.msk [vmem:[#allocation2] sm:$0x1] %vm1003_vm2, %v998_v28 }
 0x12c   :  { %1329 = shalt.err (!%p1326_p4)
}
 0x12d   :  { %1014 = dma.vmem_to_hbm [thread:$0]  %s1012_s22, 16, %s1667_s3, [#allocation3]  }
 0x12e   :  { %1338 = dma.done.wait [#allocation3], 16  }
 0x12f   :  { %1339 = vsyncadd [#allocation3], 4294967280 }
 0x130   :  { %1018 = vsyncpa [#allocation3], 1 }

</bundles_post_ra>
